<compile_context>
chip_gen: v5e
topology: v5e:2x2
jax: 0.10.0
libtpu: 0.0.40
codegen_flags: <defaults>
</compile_context>

<pallas_src>
from functools import partial

import jax
import jax.numpy as jnp
from jax.experimental import pallas as pl
from jax.experimental.pallas import tpu as pltpu


def _midam_kernel(B, ids_ref, scal_ref, batch_ref, state_in_ref,
                  state_ref, out_ref, gbuf, sem):
    # state_ref (output) is aliased to state_in_ref (input); we read and write
    # the same HBM buffer through the output ref so all DMA effects are ordered
    # on a single ref.
    del state_in_ref

    g1 = scal_ref[0]
    g2 = scal_ref[1]
    margin = scal_ref[2]
    eta = scal_ref[3]
    a = scal_ref[4]
    b = scal_ref[5]
    alpha = scal_ref[6]

    bp = batch_ref.shape[1]          # lane-padded batch size (static)

    # ---- 1) gather: one (1,128)-row DMA per bag, issue-all then wait-all ----
    def _gather_start(i, carry):
        idx = ids_ref[i]
        pltpu.make_async_copy(state_ref.at[pl.ds(idx, 1), :],
                              gbuf.at[pl.ds(i, 1), :], sem.at[0]).start()
        return carry

    def _gather_wait(i, carry):
        idx = ids_ref[i]
        pltpu.make_async_copy(state_ref.at[pl.ds(idx, 1), :],
                              gbuf.at[pl.ds(i, 1), :], sem.at[0]).wait()
        return carry

    jax.lax.fori_loop(0, B, _gather_start, 0)
    jax.lax.fori_loop(0, B, _gather_wait, 0)

    # ---- 2) lane-dense compute on (1, bp) rows ----
    sn = batch_ref[0:1, :]           # model numerator
    sd = batch_ref[1:2, :]           # model denominator
    pmask = batch_ref[2:3, :]        # 1.0 for positive bags
    lane_idx = jax.lax.broadcasted_iota(jnp.int32, (1, bp), 1)
    valid = (lane_idx < B).astype(jnp.float32)   # real (non-pad) lanes, B static
    nmask = valid - pmask

    # gathered per-bag rows -> lane vectors (old sn in lane 0, old sd in lane 1)
    g_t = jnp.transpose(gbuf[...])                      # (128, bp)
    old_sn = jnp.where(valid > 0.0, g_t[0:1, :], 1.0)   # guard pad/garbage lanes
    old_sd = jnp.where(valid > 0.0, g_t[1:2, :], 1.0)

    # Moving-average state update (stored UNclamped, exactly like torch; the
    # clamp below only affects the local value used in the loss).
    vsn = (1.0 - g1) * old_sn + g1 * sn
    vsd_store = (1.0 - g2) * old_sd + g2 * sd

    vsd = jnp.maximum(vsd_store, 1e-8)
    inv_vsd = pl.reciprocal(vsd, approx=True)           # EUP, not VALU divide
    ratio = vsn * inv_vsd
    snd = jax.nn.sigmoid(ratio)
    gsnd = snd * (1.0 - snd)
    gw_att = gsnd * inv_vsd * (sn - ratio * sd)

    # Per-class counts -> per-element mean weights.  n_n = B - n_p saves one
    # cross-lane reduction (B static).  Guarded against an empty class (torch
    # would NaN there; with both classes present this is identical).
    n_p = jnp.sum(pmask, keepdims=True)                 # (1, 1)
    n_n = float(B) - n_p
    wp = pmask * (1.0 / jnp.maximum(n_p, 1.0))
    wn = nmask * (1.0 / jnp.maximum(n_n, 1.0))

    # loss = gw_p + gw_n + gw_s + ga + gb, folded into per-element weights:
    #   wp*((2*(snd-a) - alpha)*gw_att + (snd-a)^2)
    # + wn*((2*(snd-b) + alpha)*gw_att + (snd-b)^2)
    da = snd - a
    db = snd - b
    loss_elem = (wp * ((2.0 * da - alpha) * gw_att + da * da)
                 + wn * ((2.0 * db + alpha) * gw_att + db * db))
    dual_elem = (wn - wp) * snd                         # mean_n(snd)-mean_p(snd)

    # ONE fused cross-lane reduction for both sums.
    sums = jnp.sum(jnp.concatenate([loss_elem, dual_elem], axis=0),
                   axis=1, keepdims=True)               # (2, 1)
    loss_11 = sums[0:1, :]
    g_alpha = margin + sums[1:2, :] - alpha
    alpha_new = jnp.maximum(alpha + eta * g_alpha, 0.0)  # (1, 1)

    # Tiny scalar output block: lane 0 = loss, lane 1 = new alpha.
    olane = jax.lax.broadcasted_iota(jnp.int32, (1, 128), 1)
    out_ref[...] = jnp.where(olane == 0, loss_11,
                             jnp.where(olane == 1, alpha_new, 0.0))

    # ---- 3) scatter: re-pack updated (vsn, vsd) into per-bag rows, DMA back --
    upd = jnp.concatenate(
        [vsn, vsd_store, jnp.zeros((126, bp), jnp.float32)], axis=0)  # (128, bp)
    gbuf[...] = jnp.transpose(upd)                      # (bp, 128)

    def _scatter_start(i, carry):
        idx = ids_ref[i]
        pltpu.make_async_copy(gbuf.at[pl.ds(i, 1), :],
                              state_ref.at[pl.ds(idx, 1), :], sem.at[1]).start()
        return carry

    def _scatter_wait(i, carry):
        idx = ids_ref[i]
        pltpu.make_async_copy(gbuf.at[pl.ds(i, 1), :],
                              state_ref.at[pl.ds(idx, 1), :], sem.at[1]).wait()
        return carry

    jax.lax.fori_loop(0, B, _scatter_start, 0)
    jax.lax.fori_loop(0, B, _scatter_wait, 0)


@partial(jax.jit, donate_argnums=(0,))
def _midam_step(state, a, b, alpha, hyper, sn_in, sd_in, y_true, ids):
    """One fused MIDAM step.  hyper = [gamma_1, gamma_2, margin, eta]."""
    B = sn_in.shape[0]
    Bp = ((B + 127) // 128) * 128          # lane-dense padding (static)
    data_len = state.shape[0]

    def row(v):
        v = jnp.asarray(v, jnp.float32).reshape(B)
        return jnp.pad(v, (0, Bp - B))

    batch = jnp.stack([
        row(sn_in),                               # 0: model numerator
        row(sd_in),                               # 1: model denominator
        row((y_true == 1).astype(jnp.float32)),   # 2: positive-bag mask
    ])                                            # (3, Bp)

    scalars = jnp.concatenate([
        jnp.asarray(hyper, jnp.float32).reshape(4),
        jnp.stack([a, b, alpha]).astype(jnp.float32),
    ])                                            # (7,)
    ids_i32 = jnp.asarray(ids, jnp.int32).reshape(B)

    state_new, out = pl.pallas_call(
        partial(_midam_kernel, B),
        out_shape=(
            jax.ShapeDtypeStruct((data_len, 128), jnp.float32),   # aliased state
            jax.ShapeDtypeStruct((1, 128), jnp.float32),          # [loss, alpha]
        ),
        in_specs=[
            pl.BlockSpec(memory_space=pltpu.MemorySpace.SMEM),    # ids
            pl.BlockSpec(memory_space=pltpu.MemorySpace.SMEM),    # scalars
            pl.BlockSpec(memory_space=pltpu.MemorySpace.VMEM),    # batch rows
            pl.BlockSpec(memory_space=pl.ANY),                    # state (HBM)
        ],
        out_specs=(
            pl.BlockSpec(memory_space=pl.ANY),                    # state (HBM)
            pl.BlockSpec(memory_space=pltpu.MemorySpace.VMEM),
        ),
        scratch_shapes=[
            pltpu.VMEM((Bp, 128), jnp.float32),                   # gather/scatter rows
            pltpu.SemaphoreType.DMA((2,)),
        ],
        input_output_aliases={3: 0},              # state updated in place
    )(ids_i32, scalars, batch, state)

    return state_new, out[0, 0], out[0, 1]


class MIDAMAttentionPoolingLoss:
    """JAX/Pallas port of MIDAM_attention_pooling_loss (forward semantics)."""

    def __init__(self, data_len, margin=0.5, gamma_1=0.9, gamma_2=0.9, eta=1.0):
        self.gamma_1 = float(gamma_1)
        self.gamma_2 = float(gamma_2)
        self.eta = float(eta)
        self.margin = float(margin)
        self.data_len = data_len
        # EMA state kept in HBM as full 128-lane rows (lane 0 = sn, lane 1 = sd)
        # so the in-kernel gather/scatter DMAs are whole 512-byte row transfers.
        self.state = jnp.ones((data_len, 128), dtype=jnp.float32)
        self.a = jnp.zeros((), dtype=jnp.float32)
        self.b = jnp.zeros((), dtype=jnp.float32)
        self.alpha = jnp.zeros((), dtype=jnp.float32)

    @property
    def sn(self):
        return self.state[:, 0]

    @property
    def sd(self):
        return self.state[:, 1]

    def update_smoothing(self, decay_factor):
        self.gamma_1 = self.gamma_1 / decay_factor
        self.gamma_2 = self.gamma_2 / decay_factor
        self.eta = self.eta / decay_factor

    def __call__(self, y_pred, y_true, ids):
        sn_in, sd_in = y_pred
        hyper = jnp.array([self.gamma_1, self.gamma_2, self.margin, self.eta],
                          dtype=jnp.float32)
        self.state, loss, self.alpha = _midam_step(
            self.state, self.a, self.b, self.alpha, hyper,
            sn_in, sd_in, y_true, ids)
        return loss   # device scalar; no host sync


def _reference_step(sn_in, sd_in, y_true, sn_state_rows, sd_state_rows,
                    a, b, alpha, g1, g2, margin, eta):
    """Pure-JAX mirror of the torch forward (for a one-shot sanity check)."""
    sn = sn_in.reshape(-1).astype(jnp.float32)
    sd = sd_in.reshape(-1).astype(jnp.float32)
    vsn = (1.0 - g1) * sn_state_rows + g1 * sn
    vsd_store = (1.0 - g2) * sd_state_rows + g2 * sd
    vsd = jnp.maximum(vsd_store, 1e-8)
    snd = jax.nn.sigmoid(vsn / vsd)
    gsnd = snd * (1.0 - snd)
    gw_att = gsnd * (sn / vsd - vsn / vsd ** 2 * sd)
    p = (y_true == 1).astype(jnp.float32)
    n = (y_true == 0).astype(jnp.float32)

    def mean(v, m):
        return jnp.sum(v * m) / jnp.sum(m)

    gw_p = mean(2.0 * (snd - a) * gw_att, p)
    gw_n = mean(2.0 * (snd - b) * gw_att, n)
    gw_s = alpha * (mean(gw_att, n) - mean(gw_att, p))
    ga = mean((snd - a) ** 2, p)
    gb = mean((snd - b) ** 2, n)
    loss = gw_p + gw_n + gw_s + ga + gb
    g_alpha = margin + mean(snd, n) - mean(snd, p) - alpha
    alpha_new = jnp.maximum(alpha + eta * g_alpha, 0.0)
    return loss, alpha_new, vsn, vsd_store


if __name__ == "__main__":
    key = jax.random.PRNGKey(0)
    k1, k2 = jax.random.split(key)

    data_len = 32
    B = 8  # bags per step; must contain both classes (as the torch code assumes)

    preds = jax.random.normal(k1, (B, 1), dtype=jnp.float32)           # sn
    denoms = jax.random.uniform(k2, (B, 1), dtype=jnp.float32) + 0.01  # sd
    y_true = jnp.array([1, 0, 1, 0, 1, 0, 1, 0], dtype=jnp.int32)
    ids = jnp.arange(B, dtype=jnp.int32)

    loss_fn = MIDAMAttentionPoolingLoss(data_len=data_len, margin=0.5,
                                        gamma_1=0.9, gamma_2=0.9, eta=1.0)

    # step 1 + numeric sanity check against a pure-JAX reference
    loss1 = loss_fn((preds, denoms), y_true, ids)
    jax.block_until_ready(loss1)

    ref_loss, ref_alpha, ref_vsn, ref_vsd = _reference_step(
        preds, denoms, y_true,
        jnp.ones((B,), jnp.float32), jnp.ones((B,), jnp.float32),
        0.0, 0.0, 0.0, 0.9, 0.9, 0.5, 1.0)

    # loss / dual variable: tolerance covers the EUP approx reciprocal (review item 5)
    assert jnp.allclose(loss1, ref_loss, rtol=1e-2, atol=1e-3), (loss1, ref_loss)
    assert jnp.allclose(loss_fn.alpha, ref_alpha, rtol=1e-2, atol=1e-3), (loss_fn.alpha, ref_alpha)
    # EMA state written back by the in-kernel DMA scatter (exact arithmetic path)
    assert jnp.allclose(loss_fn.sn[:B], ref_vsn, rtol=1e-5, atol=1e-6)
    assert jnp.allclose(loss_fn.sd[:B], ref_vsd, rtol=1e-5, atol=1e-6)
    # untouched rows must stay at their initial value of 1.0
    assert jnp.allclose(loss_fn.sn[B:], jnp.ones((data_len - B,), jnp.float32))

    # step 2: exercises the cached jit, buffer donation and in-place aliasing
    loss2 = loss_fn((preds, denoms), y_true, ids)
    jax.block_until_ready(loss2)
    jax.block_until_ready(loss_fn.alpha)
    jax.block_until_ready(loss_fn.state)
    print("KERNEL_OK")
</pallas_src>

<mosaic_0001>
module attributes {stable_mosaic.version = 11 : i64} {
  func.func @_midam_kernel(%arg0: memref<8xi32, #tpu.memory_space<smem>>, %arg1: memref<7xf32, #tpu.memory_space<smem>>, %arg2: memref<3x128xf32, #tpu.memory_space<vmem>>, %arg3: memref<32x128xf32, #tpu.memory_space<any>>, %arg4: memref<32x128xf32, #tpu.memory_space<any>>, %arg5: memref<1x128xf32, #tpu.memory_space<vmem>>, %arg6: memref<128x128xf32, #tpu.memory_space<vmem>>, %arg7: memref<2x!tpu.dma_semaphore, #tpu.memory_space<semaphore_mem>>) attributes {dimension_semantics = [], scalar_prefetch = 0 : i64, scratch_operands = 2 : i64, tpu.core_type = #tpu.core_type<tc>} {
    %c0 = arith.constant 0 : index
    %0 = memref.load %arg1[%c0] : memref<7xf32, #tpu.memory_space<smem>>
    %c1 = arith.constant 1 : index
    %1 = memref.load %arg1[%c1] : memref<7xf32, #tpu.memory_space<smem>>
    %c2 = arith.constant 2 : index
    %2 = memref.load %arg1[%c2] : memref<7xf32, #tpu.memory_space<smem>>
    %c3 = arith.constant 3 : index
    %3 = memref.load %arg1[%c3] : memref<7xf32, #tpu.memory_space<smem>>
    %c4 = arith.constant 4 : index
    %4 = memref.load %arg1[%c4] : memref<7xf32, #tpu.memory_space<smem>>
    %c5 = arith.constant 5 : index
    %5 = memref.load %arg1[%c5] : memref<7xf32, #tpu.memory_space<smem>>
    %c6 = arith.constant 6 : index
    %6 = memref.load %arg1[%c6] : memref<7xf32, #tpu.memory_space<smem>>
    %c0_i32 = arith.constant 0 : i32
    %c8_i32 = arith.constant 8 : i32
    %7 = arith.addi %c0_i32, %c8_i32 : i32
    %c1_i32 = arith.constant 1 : i32
    scf.for %arg8 = %c0_i32 to %7 step %c1_i32  : i32 {
      %134 = arith.index_cast %arg8 : i32 to index
      %135 = memref.load %arg0[%134] : memref<8xi32, #tpu.memory_space<smem>>
      %c0_i32_48 = arith.constant 0 : i32
      %c0_i32_49 = arith.constant 0 : i32
      %136 = tpu.memref_slice %arg4[%135, %c0_i32_49] : memref<32x128xf32, #tpu.memory_space<any>> -> memref<1x128xf32, #tpu.memory_space<any>>
      %c0_i32_50 = arith.constant 0 : i32
      %137 = tpu.memref_slice %arg6[%arg8, %c0_i32_50] : memref<128x128xf32, #tpu.memory_space<vmem>> -> memref<1x128xf32, #tpu.memory_space<vmem>>
      %138 = tpu.memref_slice %arg7[%c0_i32_48] : memref<2x!tpu.dma_semaphore, #tpu.memory_space<semaphore_mem>> -> memref<1x!tpu.dma_semaphore, #tpu.memory_space<semaphore_mem>>
      %139 = tpu.memref_squeeze %138 : memref<1x!tpu.dma_semaphore, #tpu.memory_space<semaphore_mem>> -> memref<!tpu.dma_semaphore, #tpu.memory_space<semaphore_mem>>
      tpu.enqueue_dma source(%136 : memref<1x128xf32, #tpu.memory_space<any>>) target(%137 : memref<1x128xf32, #tpu.memory_space<vmem>>) target_semaphore(%139 : memref<!tpu.dma_semaphore, #tpu.memory_space<semaphore_mem>>)
    }
    %c8_i32_0 = arith.constant 8 : i32
    %c0_i32_1 = arith.constant 0 : i32
    %c8_i32_2 = arith.constant 8 : i32
    %8 = arith.addi %c0_i32_1, %c8_i32_2 : i32
    %c1_i32_3 = arith.constant 1 : i32
    scf.for %arg8 = %c0_i32_1 to %8 step %c1_i32_3  : i32 {
      %134 = arith.index_cast %arg8 : i32 to index
      %135 = memref.load %arg0[%134] : memref<8xi32, #tpu.memory_space<smem>>
      %c0_i32_48 = arith.constant 0 : i32
      %c0_i32_49 = arith.constant 0 : i32
      %136 = tpu.memref_slice %arg4[%135, %c0_i32_49] : memref<32x128xf32, #tpu.memory_space<any>> -> memref<1x128xf32, #tpu.memory_space<any>>
      %c0_i32_50 = arith.constant 0 : i32
      %137 = tpu.memref_slice %arg6[%arg8, %c0_i32_50] : memref<128x128xf32, #tpu.memory_space<vmem>> -> memref<1x128xf32, #tpu.memory_space<vmem>>
      %138 = tpu.memref_slice %arg7[%c0_i32_48] : memref<2x!tpu.dma_semaphore, #tpu.memory_space<semaphore_mem>> -> memref<1x!tpu.dma_semaphore, #tpu.memory_space<semaphore_mem>>
      %139 = tpu.memref_squeeze %138 : memref<1x!tpu.dma_semaphore, #tpu.memory_space<semaphore_mem>> -> memref<!tpu.dma_semaphore, #tpu.memory_space<semaphore_mem>>
      tpu.wait_dma2 semaphore(%139 : memref<!tpu.dma_semaphore, #tpu.memory_space<semaphore_mem>>) src(%136 : memref<1x128xf32, #tpu.memory_space<any>>) dst(%137 : memref<1x128xf32, #tpu.memory_space<vmem>>)
    }
    %c8_i32_4 = arith.constant 8 : i32
    %c0_5 = arith.constant 0 : index
    %c0_6 = arith.constant 0 : index
    %9 = vector.load %arg2[%c0_5, %c0_6] : memref<3x128xf32, #tpu.memory_space<vmem>>, vector<1x128xf32>
    %c1_7 = arith.constant 1 : index
    %c0_8 = arith.constant 0 : index
    %10 = vector.load %arg2[%c1_7, %c0_8] : memref<3x128xf32, #tpu.memory_space<vmem>>, vector<1x128xf32>
    %c2_9 = arith.constant 2 : index
    %c0_10 = arith.constant 0 : index
    %11 = vector.load %arg2[%c2_9, %c0_10] : memref<3x128xf32, #tpu.memory_space<vmem>>, vector<1x128xf32>
    %12 = tpu.iota {dimensions = array<i32: 1>} : vector<1x128xi32>
    %c8_i32_11 = arith.constant 8 : i32
    %13 = vector.broadcast %c8_i32_11 : i32 to vector<1x128xi32>
    %14 = arith.cmpi slt, %12, %13 : vector<1x128xi32>
    %15 = arith.extui %14 : vector<1x128xi1> to vector<1x128xi32>
    %16 = arith.sitofp %15 : vector<1x128xi32> to vector<1x128xf32>
    %17 = arith.subf %16, %11 : vector<1x128xf32>
    %c0_12 = arith.constant 0 : index
    %c0_13 = arith.constant 0 : index
    %18 = vector.load %arg6[%c0_12, %c0_13] : memref<128x128xf32, #tpu.memory_space<vmem>>, vector<128x128xf32>
    %19 = tpu.transpose %18, [1, 0] : vector<128x128xf32> -> vector<128x128xf32>
    %cst = arith.constant 0.000000e+00 : f32
    %20 = vector.broadcast %cst : f32 to vector<1x128xf32>
    %21 = arith.cmpf ogt, %16, %20 : vector<1x128xf32>
    %22 = vector.extract_strided_slice %19 {offsets = [0, 0], sizes = [1, 128], strides = [1, 1]} : vector<128x128xf32> to vector<1x128xf32>
    %cst_14 = arith.constant 1.000000e+00 : f32
    %23 = vector.broadcast %cst_14 : f32 to vector<1x128xf32>
    %24 = arith.select %21, %22, %23 : vector<1x128xi1>, vector<1x128xf32>
    %cst_15 = arith.constant 0.000000e+00 : f32
    %25 = vector.broadcast %cst_15 : f32 to vector<1x128xf32>
    %26 = arith.cmpf ogt, %16, %25 : vector<1x128xf32>
    %27 = vector.extract_strided_slice %19 {offsets = [1, 0], sizes = [1, 128], strides = [1, 1]} : vector<128x128xf32> to vector<1x128xf32>
    %cst_16 = arith.constant 1.000000e+00 : f32
    %28 = vector.broadcast %cst_16 : f32 to vector<1x128xf32>
    %29 = arith.select %26, %27, %28 : vector<1x128xi1>, vector<1x128xf32>
    %cst_17 = arith.constant 1.000000e+00 : f32
    %30 = arith.subf %cst_17, %0 : f32
    %31 = vector.broadcast %30 : f32 to vector<1x128xf32>
    %32 = arith.mulf %31, %24 : vector<1x128xf32>
    %33 = vector.broadcast %0 : f32 to vector<1x128xf32>
    %34 = arith.mulf %33, %9 : vector<1x128xf32>
    %35 = arith.addf %32, %34 : vector<1x128xf32>
    %cst_18 = arith.constant 1.000000e+00 : f32
    %36 = arith.subf %cst_18, %1 : f32
    %37 = vector.broadcast %36 : f32 to vector<1x128xf32>
    %38 = arith.mulf %37, %29 : vector<1x128xf32>
    %39 = vector.broadcast %1 : f32 to vector<1x128xf32>
    %40 = arith.mulf %39, %10 : vector<1x128xf32>
    %41 = arith.addf %38, %40 : vector<1x128xf32>
    %cst_19 = arith.constant 9.99999993E-9 : f32
    %42 = vector.broadcast %cst_19 : f32 to vector<1x128xf32>
    %43 = arith.maximumf %41, %42 : vector<1x128xf32>
    %44 = tpu.reciprocal %43 {approx = true} : vector<1x128xf32> -> vector<1x128xf32>
    %45 = arith.mulf %35, %44 : vector<1x128xf32>
    %46 = arith.negf %45 : vector<1x128xf32>
    %47 = math.exp %46 : vector<1x128xf32>
    %cst_20 = arith.constant 1.000000e+00 : f32
    %48 = vector.broadcast %cst_20 : f32 to vector<1x128xf32>
    %49 = arith.addf %48, %47 : vector<1x128xf32>
    %50 = arith.divf %48, %49 : vector<1x128xf32>
    %cst_21 = arith.constant 1.000000e+00 : f32
    %51 = vector.broadcast %cst_21 : f32 to vector<1x128xf32>
    %52 = arith.subf %51, %50 : vector<1x128xf32>
    %53 = arith.mulf %50, %52 : vector<1x128xf32>
    %54 = arith.mulf %53, %44 : vector<1x128xf32>
    %55 = arith.mulf %45, %10 : vector<1x128xf32>
    %56 = arith.subf %9, %55 : vector<1x128xf32>
    %57 = arith.mulf %54, %56 : vector<1x128xf32>
    %58 = vector.shape_cast %11 : vector<1x128xf32> to vector<1x1x128xf32>
    %cst_22 = arith.constant dense<0.000000e+00> : vector<1xf32>
    %59 = vector.multi_reduction <add>, %58, %cst_22 [1, 2] : vector<1x1x128xf32> to vector<1xf32>
    %60 = vector.shape_cast %59 : vector<1xf32> to vector<1x1x1xf32>
    %61 = vector.extract %60[0, 0, 0] : f32 from vector<1x1x1xf32>
    %62 = vector.broadcast %61 : f32 to vector<1x1xf32>
    %cst_23 = arith.constant 8.000000e+00 : f32
    %63 = vector.broadcast %cst_23 : f32 to vector<1x1xf32>
    %64 = arith.subf %63, %62 : vector<1x1xf32>
    %cst_24 = arith.constant 1.000000e+00 : f32
    %65 = vector.broadcast %cst_24 : f32 to vector<1x1xf32>
    %66 = arith.maximumf %62, %65 : vector<1x1xf32>
    %cst_25 = arith.constant 1.000000e+00 : f32
    %67 = vector.broadcast %cst_25 : f32 to vector<1x1xf32>
    %68 = arith.divf %67, %66 : vector<1x1xf32>
    %69 = vector.broadcast %68 : vector<1x1xf32> to vector<1x128xf32>
    %70 = arith.mulf %11, %69 : vector<1x128xf32>
    %cst_26 = arith.constant 1.000000e+00 : f32
    %71 = vector.broadcast %cst_26 : f32 to vector<1x1xf32>
    %72 = arith.maximumf %64, %71 : vector<1x1xf32>
    %cst_27 = arith.constant 1.000000e+00 : f32
    %73 = vector.broadcast %cst_27 : f32 to vector<1x1xf32>
    %74 = arith.divf %73, %72 : vector<1x1xf32>
    %75 = vector.broadcast %74 : vector<1x1xf32> to vector<1x128xf32>
    %76 = arith.mulf %17, %75 : vector<1x128xf32>
    %77 = vector.broadcast %4 : f32 to vector<1x128xf32>
    %78 = arith.subf %50, %77 : vector<1x128xf32>
    %79 = vector.broadcast %5 : f32 to vector<1x128xf32>
    %80 = arith.subf %50, %79 : vector<1x128xf32>
    %cst_28 = arith.constant 2.000000e+00 : f32
    %81 = vector.broadcast %cst_28 : f32 to vector<1x128xf32>
    %82 = arith.mulf %81, %78 : vector<1x128xf32>
    %83 = vector.broadcast %6 : f32 to vector<1x128xf32>
    %84 = arith.subf %82, %83 : vector<1x128xf32>
    %85 = arith.mulf %84, %57 : vector<1x128xf32>
    %86 = arith.mulf %78, %78 : vector<1x128xf32>
    %87 = arith.addf %85, %86 : vector<1x128xf32>
    %88 = arith.mulf %70, %87 : vector<1x128xf32>
    %cst_29 = arith.constant 2.000000e+00 : f32
    %89 = vector.broadcast %cst_29 : f32 to vector<1x128xf32>
    %90 = arith.mulf %89, %80 : vector<1x128xf32>
    %91 = vector.broadcast %6 : f32 to vector<1x128xf32>
    %92 = arith.addf %90, %91 : vector<1x128xf32>
    %93 = arith.mulf %92, %57 : vector<1x128xf32>
    %94 = arith.mulf %80, %80 : vector<1x128xf32>
    %95 = arith.addf %93, %94 : vector<1x128xf32>
    %96 = arith.mulf %76, %95 : vector<1x128xf32>
    %97 = arith.addf %88, %96 : vector<1x128xf32>
    %98 = arith.subf %76, %70 : vector<1x128xf32>
    %99 = arith.mulf %98, %50 : vector<1x128xf32>
    %100 = tpu.concatenate %97, %99 in 0 : vector<1x128xf32>, vector<1x128xf32> -> vector<2x128xf32>
    %cst_30 = arith.constant dense<0.000000e+00> : vector<2xf32>
    %101 = vector.multi_reduction <add>, %100, %cst_30 [1] : vector<2x128xf32> to vector<2xf32>
    %102 = vector.shape_cast %101 : vector<2xf32> to vector<2x1xf32>
    %103 = vector.extract_strided_slice %102 {offsets = [0, 0], sizes = [1, 1], strides = [1, 1]} : vector<2x1xf32> to vector<1x1xf32>
    %104 = vector.extract_strided_slice %102 {offsets = [1, 0], sizes = [1, 1], strides = [1, 1]} : vector<2x1xf32> to vector<1x1xf32>
    %105 = vector.broadcast %2 : f32 to vector<1x1xf32>
    %106 = arith.addf %105, %104 : vector<1x1xf32>
    %107 = vector.broadcast %6 : f32 to vector<1x1xf32>
    %108 = arith.subf %106, %107 : vector<1x1xf32>
    %109 = vector.broadcast %3 : f32 to vector<1x1xf32>
    %110 = arith.mulf %109, %108 : vector<1x1xf32>
    %111 = vector.broadcast %6 : f32 to vector<1x1xf32>
    %112 = arith.addf %111, %110 : vector<1x1xf32>
    %cst_31 = arith.constant 0.000000e+00 : f32
    %113 = vector.broadcast %cst_31 : f32 to vector<1x1xf32>
    %114 = arith.maximumf %112, %113 : vector<1x1xf32>
    %115 = tpu.iota {dimensions = array<i32: 1>} : vector<1x128xi32>
    %c0_i32_32 = arith.constant 0 : i32
    %116 = vector.broadcast %c0_i32_32 : i32 to vector<1x128xi32>
    %117 = arith.cmpi eq, %115, %116 : vector<1x128xi32>
    %c1_i32_33 = arith.constant 1 : i32
    %118 = vector.broadcast %c1_i32_33 : i32 to vector<1x128xi32>
    %119 = arith.cmpi eq, %115, %118 : vector<1x128xi32>
    %cst_34 = arith.constant 0.000000e+00 : f32
    %120 = vector.shape_cast %114 : vector<1x1xf32> to vector<1x1xf32>
    %121 = vector.broadcast %120 : vector<1x1xf32> to vector<1x128xf32>
    %122 = vector.broadcast %cst_34 : f32 to vector<1x128xf32>
    %123 = arith.select %119, %121, %122 : vector<1x128xi1>, vector<1x128xf32>
    %124 = vector.shape_cast %103 : vector<1x1xf32> to vector<1x1xf32>
    %125 = vector.broadcast %124 : vector<1x1xf32> to vector<1x128xf32>
    %126 = arith.select %117, %125, %123 : vector<1x128xi1>, vector<1x128xf32>
    %c0_35 = arith.constant 0 : index
    %c0_36 = arith.constant 0 : index
    %127 = vector.load %arg5[%c0_35, %c0_36] : memref<1x128xf32, #tpu.memory_space<vmem>>, vector<1x128xf32>
    tpu.vector_store %arg5[%c0_35, %c0_36], %126 {strides = array<i32>} : memref<1x128xf32, #tpu.memory_space<vmem>>, vector<1x128xf32>,
    %cst_37 = arith.constant 0.000000e+00 : f32
    %128 = vector.broadcast %cst_37 : f32 to vector<126x128xf32>
    %129 = tpu.concatenate %35, %41, %128 in 0 : vector<1x128xf32>, vector<1x128xf32>, vector<126x128xf32> -> vector<128x128xf32>
    %130 = tpu.transpose %129, [1, 0] : vector<128x128xf32> -> vector<128x128xf32>
    %c0_38 = arith.constant 0 : index
    %c0_39 = arith.constant 0 : index
    %131 = vector.load %arg6[%c0_38, %c0_39] : memref<128x128xf32, #tpu.memory_space<vmem>>, vector<128x128xf32>
    tpu.vector_store %arg6[%c0_38, %c0_39], %130 {strides = array<i32>} : memref<128x128xf32, #tpu.memory_space<vmem>>, vector<128x128xf32>,
    %c0_i32_40 = arith.constant 0 : i32
    %c8_i32_41 = arith.constant 8 : i32
    %132 = arith.addi %c0_i32_40, %c8_i32_41 : i32
    %c1_i32_42 = arith.constant 1 : i32
    scf.for %arg8 = %c0_i32_40 to %132 step %c1_i32_42  : i32 {
      %134 = arith.index_cast %arg8 : i32 to index
      %135 = memref.load %arg0[%134] : memref<8xi32, #tpu.memory_space<smem>>
      %c1_i32_48 = arith.constant 1 : i32
      %c0_i32_49 = arith.constant 0 : i32
      %136 = tpu.memref_slice %arg6[%arg8, %c0_i32_49] : memref<128x128xf32, #tpu.memory_space<vmem>> -> memref<1x128xf32, #tpu.memory_space<vmem>>
      %c0_i32_50 = arith.constant 0 : i32
      %137 = tpu.memref_slice %arg4[%135, %c0_i32_50] : memref<32x128xf32, #tpu.memory_space<any>> -> memref<1x128xf32, #tpu.memory_space<any>>
      %138 = tpu.memref_slice %arg7[%c1_i32_48] : memref<2x!tpu.dma_semaphore, #tpu.memory_space<semaphore_mem>> -> memref<1x!tpu.dma_semaphore, #tpu.memory_space<semaphore_mem>>
      %139 = tpu.memref_squeeze %138 : memref<1x!tpu.dma_semaphore, #tpu.memory_space<semaphore_mem>> -> memref<!tpu.dma_semaphore, #tpu.memory_space<semaphore_mem>>
      tpu.enqueue_dma source(%136 : memref<1x128xf32, #tpu.memory_space<vmem>>) target(%137 : memref<1x128xf32, #tpu.memory_space<any>>) target_semaphore(%139 : memref<!tpu.dma_semaphore, #tpu.memory_space<semaphore_mem>>)
    }
    %c8_i32_43 = arith.constant 8 : i32
    %c0_i32_44 = arith.constant 0 : i32
    %c8_i32_45 = arith.constant 8 : i32
    %133 = arith.addi %c0_i32_44, %c8_i32_45 : i32
    %c1_i32_46 = arith.constant 1 : i32
    scf.for %arg8 = %c0_i32_44 to %133 step %c1_i32_46  : i32 {
      %134 = arith.index_cast %arg8 : i32 to index
      %135 = memref.load %arg0[%134] : memref<8xi32, #tpu.memory_space<smem>>
      %c1_i32_48 = arith.constant 1 : i32
      %c0_i32_49 = arith.constant 0 : i32
      %136 = tpu.memref_slice %arg6[%arg8, %c0_i32_49] : memref<128x128xf32, #tpu.memory_space<vmem>> -> memref<1x128xf32, #tpu.memory_space<vmem>>
      %c0_i32_50 = arith.constant 0 : i32
      %137 = tpu.memref_slice %arg4[%135, %c0_i32_50] : memref<32x128xf32, #tpu.memory_space<any>> -> memref<1x128xf32, #tpu.memory_space<any>>
      %138 = tpu.memref_slice %arg7[%c1_i32_48] : memref<2x!tpu.dma_semaphore, #tpu.memory_space<semaphore_mem>> -> memref<1x!tpu.dma_semaphore, #tpu.memory_space<semaphore_mem>>
      %139 = tpu.memref_squeeze %138 : memref<1x!tpu.dma_semaphore, #tpu.memory_space<semaphore_mem>> -> memref<!tpu.dma_semaphore, #tpu.memory_space<semaphore_mem>>
      tpu.wait_dma2 semaphore(%139 : memref<!tpu.dma_semaphore, #tpu.memory_space<semaphore_mem>>) src(%136 : memref<1x128xf32, #tpu.memory_space<vmem>>) dst(%137 : memref<1x128xf32, #tpu.memory_space<any>>)
    }
    %c8_i32_47 = arith.constant 8 : i32
    return
  }
}

</mosaic_0001>

<bundles_post_ra>
// kernel: _midam_step.1
= control target key start
LH: loop header
LB: loop body
LE: loop exit
PB: predicated region body
PF: predicated region fallthrough
CT: control target
= control target key end

     0   :  { %11 = vsyncpa [#allocation5], 0  ;;  %s724_s0 = inlined_call_operand.vmem [shape: s32[8], index: 0, kind: input, shape index: {}]   ;;  %s725_s1 = inlined_call_operand.vmem [shape: f32[7], index: 1, kind: input, shape index: {}]   ;;  %s726_s2 = inlined_call_operand.vmem [shape: f32[3,128], index: 2, kind: input, shape index: {}]   ;;  %s727_s3 = inlined_call_operand.hbm [shape: f32[32,128], index: 3, kind: input, shape index: {}, may-alias: {3,4}]   ;;  %s728_s4 = inlined_call_operand.hbm [shape: f32[32,128], index: 4, kind: output, shape index: {0}, may-alias: {3,4}]   ;;  %s729_s5 = inlined_call_operand.vmem [shape: f32[1,128], index: 5, kind: output, shape index: {1}]  }
   0x1   :  { %s18_s20 = sshll.u32 %s724_s0, 4  ;;  %s19_s20 = int_to_ptr.vmem [resolvable:$true] %s18_s20 }
   0x2   :  { %12 = vsyncpa [#allocation7], 0  ;;  %s27_s23 = sshll.u32 %s725_s1, 4  ;;  %s572_s24 = smov [#allocation4]   ;;  %s28_s23 = int_to_ptr.vmem [resolvable:$true] %s27_s23 }
   0x3   :  { %21 = dma.vmem_to_smem %s19_s20, 16, %s572_s24, [#allocation5]  }
   0x4   :  { %s573_s3 = smov [#allocation6]  }
   0x5   :  { %30 = dma.vmem_to_smem %s28_s23, 16, %s573_s3, [#allocation7]  }
   0x6   :  { %548 = dma.done.wait [#allocation5], 16  }
   0x7   :  { %549 = vsyncadd [#allocation5], 4294967280 }
   0x8   :  { %550 = dma.done.wait [#allocation7], 16  }
   0x9   :  { %551 = vsyncadd [#allocation7], 4294967280 }
   0xa   :  { %41 = sfence }
   0xb   :  { %s612_s25 = sld [smem:[#allocation6]]  ;;  %s626_s30 = smov 0  }
   0xc   :  { %s614_s26 = sld [smem:[#allocation6 + $0x1]] }
   0xd   :  { %s616_s0 = sld [smem:[#allocation6 + $0x2]] }
   0xe   :  { %s618_s27 = sld [smem:[#allocation6 + $0x3]] }
   0xf   :  { %s620_s28 = sld [smem:[#allocation6 + $0x4]] }
  0x10   :  { %s622_s1 = sld [smem:[#allocation6 + $0x5]] }
  0x11   :  { %s624_s29 = sld [smem:[#allocation6 + $0x6]] }
  0x12 LB: > { %s55_s6 = sld [smem:[#allocation4 + %s558_s30]]  ;;  %s57_s7 = scalar_lea.vmem [#allocation2], %s558_s30  ;;  %s558_s30 = sphi %s626_s30, %s54_s30  }
  0x13   : > { %s67_s8 = sshll.u32 %s57_s7, 4  ;;  %s488_s17 = scalar_lea.hbm %s728_s4, 32  ;;  %s68_s8 = int_to_ptr.vmem [resolvable:$true] %s67_s8 }
  0x18   : > { %s56_s11 = scalar_lea.hbm %s728_s4, %s55_s6 }
  0x19   : > { %s65_s12 = sshll.u32 %s56_s11, 4  ;;  %s66_s12 = int_to_ptr.hbm [resolvable:$true] %s65_s12 }
  0x1a   : > { %s484_s13 = sshra.s32 %s66_s12, 4  ;;  %s485_s13 = int_to_ptr.hbm [resolvable:$true] %s484_s13 }
  0x1b   : > { %s486_s14 = scalar_lea.hbm %s485_s13, 1  ;;  %p489_p1 = scmp.lt.s32.totalorder %s485_s13, %s728_s4 }
  0x1c   : > { %p487_p0 = scmp.ne.s32.totalorder %s485_s13, %s486_s14  ;;  %p490_p2 = scmp.lt.s32.totalorder %s488_s17, %s486_s14 }
  0x1e   : > { %p491_p3 = por %p490_p2, %p489_p1 }
  0x20   : > { %p492_p4 = pnand %p491_p3, %p487_p0 }
  0x22   : > { %495 = shalt.err (!%p492_p4)  }
  0x23   : > { %s496_s22 = sshra.s32 %s68_s8, 4  ;;  %s574_s24 = smov [#allocation2]   ;;  %s497_s22 = int_to_ptr.vmem [resolvable:$true] %s496_s22 }
  0x24   : > { %s498_s23 = scalar_lea.vmem %s497_s22, 1  ;;  %s646_s3 = scalar_lea.vmem %s574_s24, 128 }
  0x25   : > { %p499_p5 = scmp.ne.s32.totalorder %s497_s22, %s498_s23  ;;  %p501_p6 = scmp.lt.s32.totalorder %s497_s22, [#allocation2] }
  0x26   : > { %p502_p7 = scmp.lt.s32.totalorder %s646_s3, %s498_s23 }
  0x28   : > { %p503_p8 = por %p502_p7, %p501_p6 }
  0x2a   : > { %p504_p9 = pnand %p503_p8, %p499_p5 }
  0x2c   : > { %507 = shalt.err (!%p504_p9)  }
  0x2d   : > { %70 = dma.hbm_to_vmem [thread:$0]  %s66_s12, 16, %s68_s8, [#allocation3] }
  0x2e   : > { %s54_s30 = sadd.s32 1, %s558_s30  }
  0x2f   : > { %p51_p10 = scmp.ge.s32.totalorder %s54_s30, 8  }
  0x30   :  { %s560_s6 = smov (%p51_p10), 0  }
  0x31   :  { %53 = sbr.rel (!%p51_p10) target bundleno = 18 (0x12), region = 83 }
  0x36 LB: > { %552 = dma.done.wait [#allocation3], 16  ;;  %s562_s6 = sphi %s560_s6, %s76_s6  }
  0x37   : > { %553 = vsyncadd [#allocation3], 4294967280  ;;  %s76_s6 = sadd.s32 1, %s562_s6  }
  0x38   : > { %p73_p11 = scmp.ge.s32.totalorder %s76_s6, 8  }
  0x39   :  { %v655_v0 = vld [vmem:[%s726_s2 + $0x2] sm:$0x1] (%p73_p11)  ;;  %vm186_vm0 = vcmask (%p73_p11), 1040384   ;;  %v91_v3 = vld [vmem:[#allocation2 + $0x8] sm:$0xff] (%p73_p11)  ;;  %v92_v4 = vld [vmem:[#allocation2 + $0x10] sm:$0xff] (%p73_p11)  ;;  %v84_v25 = vlaneseq (%p73_p11)  ;;  %v149_v27 = vstv (%p73_p11), %s614_s26  ;;  %s140_s10 = ssub.f32 (%p73_p11), 1.0, %s612_s25  ;;  %v143_v32 = vstv (%p73_p11), %s612_s25 }
  0x3a   :  { %75 = sbr.rel (!%p73_p11) target bundleno = 54 (0x36), region = 94  ;;  %v187_v1 = vsel (%p73_p11), %vm186_vm0, %v655_v0, 0.0  ;;  %v90_v2 = vld [vmem:[#allocation2] sm:$0xff] (%p73_p11)  ;;  %v93_v5 = vld [vmem:[#allocation2 + $0x18] sm:$0xff] (%p73_p11)  ;;  %v95_v7 = vld [vmem:[#allocation2 + $0x28] sm:$0xff] (%p73_p11)  ;;  %s146_s11 = ssub.f32 (%p73_p11), 1.0, %s614_s26 }
  0x3b   :  { %188 = vadd.xlane.f32.xlu0 (%p73_p11), %v187_v1  ;;  %v94_v6 = vld [vmem:[#allocation2 + $0x20] sm:$0xff] (%p73_p11)  ;;  %v96_v8 = vld [vmem:[#allocation2 + $0x30] sm:$0xff] (%p73_p11)  ;;  %v97_v9 = vld [vmem:[#allocation2 + $0x38] sm:$0xff] (%p73_p11)  ;;  %v659_v26 = vand.u32 (%p73_p11), 127, %v84_v25  ;;  %v575_v30 = vmov (%p73_p11), 0.0   ;;  %v141_v35 = vstv (%p73_p11), %s140_s10  ;;  %vm257_vm3 = vcmask (%p73_p11), 1041408  }
  0x3c   :  { %v98_v10 = vld [vmem:[#allocation2 + $0x40] sm:$0xff] (%p73_p11)  ;;  %v99_v11 = vld [vmem:[#allocation2 + $0x48] sm:$0xff] (%p73_p11)  ;;  %v100_v15 = vld [vmem:[#allocation2 + $0x50] sm:$0xff] (%p73_p11)  ;;  %v147_v36 = vstv (%p73_p11), %s146_s11  ;;  %s703_s26 = smov (%p73_p11), 0  }
  0x3d   :  { %v101_v20 = vld [vmem:[#allocation2 + $0x58] sm:$0xff] (%p73_p11)  ;;  %v102_v21 = vld [vmem:[#allocation2 + $0x60] sm:$0xff] (%p73_p11)  ;;  %v103_v22 = vld [vmem:[#allocation2 + $0x68] sm:$0xff] (%p73_p11)  ;;  %vm86_vm1 = vcmp.lt.s32.totalorder (%p73_p11), %v659_v26, 8 }
  0x3e   :  { %v104_v23 = vld [vmem:[#allocation2 + $0x70] sm:$0xff] (%p73_p11)  ;;  %v105_v24 = vld [vmem:[#allocation2 + $0x78] sm:$0xff] (%p73_p11)  ;;  %v82_v28 = vld [vmem:[%s726_s2 + $0x1] sm:$0x1] (%p73_p11)  ;;  %v668_v31 = vsel (%p73_p11), %vm86_vm1, 1.0, %v575_v30  ;;  %vm268_vm1 = vcmp.eq.s32.totalorder (%p73_p11), %v659_v26, 0 }
  0x3f   :  { %v150_v29 = vmul.f32 %v149_v27, %v82_v28  ;;  %v674_v33 = vld [vmem:[%s726_s2] sm:$0x1]  ;;  %vm138_vm2 = vcmp.gt.f32.partialorder %v668_v31, 0.0  ;;  %v233_v27 = vstv %s620_s28 }
  0x40   :  { %v144_v38 = vmul.f32 %v143_v32, %v674_v33 }
  0x41   :  { %v152_v39 = vrot.slane %v150_v29, 7 }
  0x64   :  { %106 = vxpose.xlu0.b32.start [1/16] (narrow) %v90_v2, 8 }
  0x6c   :  { %107 = vxpose.xlu0.b32.cont [2/16] (narrow) %v91_v3, 8 }
  0x74   :  { %108 = vxpose.xlu0.b32.cont [3/16] (narrow) %v92_v4, 8 }
  0x7c   :  { %109 = vxpose.xlu0.b32.cont [4/16] (narrow) %v93_v5, 8 }
  0x84   :  { %110 = vxpose.xlu0.b32.cont [5/16] (narrow) %v94_v6, 8 }
  0x8c   :  { %111 = vxpose.xlu0.b32.cont [6/16] (narrow) %v95_v7, 8 }
  0x94   :  { %112 = vxpose.xlu0.b32.cont [7/16] (narrow) %v96_v8, 8 }
  0x9c   :  { %113 = vxpose.xlu0.b32.cont [8/16] (narrow) %v97_v9, 8 }
  0xa4   :  { %114 = vxpose.xlu0.b32.cont [9/16] (narrow) %v98_v10, 8 }
  0xac   :  { %115 = vxpose.xlu0.b32.cont [10/16] (narrow) %v99_v11, 8 }
  0xae   :  { %v189_v12 = vpop.xlane.xlu0 %188 }
  0xaf   :  { %v190_v13 = vrot.slane %v189_v12, 4 }
  0xb1   :  { %v191_v14 = vadd.f32 %v190_v13, %v189_v12 }
  0xb3   :  { %v192_v16 = vrot.slane %v191_v14, 2 }
  0xb4   :  { %116 = vxpose.xlu0.b32.cont [11/16] (narrow) %v100_v15, 8 }
  0xb5   :  { %v193_v17 = vadd.f32 %v192_v16, %v191_v14  ;;  %v89_v14 = vsub.f32 %v668_v31, %v655_v0 }
  0xb7   :  { %v194_v18 = vrot.slane %v193_v17, 1 }
  0xb9   :  { %v195_v19 = vadd.f32 %v194_v18, %v193_v17 }
  0xbb   :  { %413 = vpush %v195_v19 }
  0xbc   :  { %117 = vxpose.xlu0.b32.cont [12/16] (narrow) %v101_v20, 8 }
  0xc4   :  { %118 = vxpose.xlu0.b32.cont [13/16] (narrow) %v102_v21, 8 }
  0xcc   :  { %119 = vxpose.xlu0.b32.cont [14/16] (narrow) %v103_v22, 8 }
  0xd4   :  { %120 = vxpose.xlu0.b32.cont [15/16] (narrow) %v104_v23, 8 }
  0xdc   :  { %121 = vxpose.xlu0.b32.end [16/16] (narrow) %v105_v24, 8 }
  0xec   :  { %s414_s12 = spop %413 }
  0xed   :  { %v197_v34 = vstv %s414_s12 }
  0xee   :  { %v198_v41 = vsub.f32 8.0, %v197_v34  ;;  %v199_v50 = vmax.f32 %v197_v34, 1.0 }
  0xf0   :  { %v216_v46 = vmax.f32 %v198_v41, 1.0  ;;  %v211_v8 = vand.u32 2147483648, %v199_v50  ;;  %vm205_vm8 = vweird.f32 %v199_v50  ;;  %v209_v9 = vand.u32 2147483647, %v199_v50 }
  0xf2   :  { %v228_v5 = vand.u32 2147483648, %v216_v46  ;;  %vm222_vm6 = vweird.f32 %v216_v46  ;;  %v226_v7 = vand.u32 2147483647, %v216_v46  ;;  %v212_v16 = vor.u32 1.1754944e-38, %v211_v8 }
  0xf3   :  { %vm210_vm11 = vcmp.eq.f32.partialorder %v209_v9, 8.507059e+37  ;;  %v261_v9 = vstv %s616_s0 }
  0xf4   :  { %v229_v12 = vor.u32 1.1754944e-38, %v228_v5  ;;  %vm227_vm10 = vcmp.eq.f32.partialorder %v226_v7, 8.507059e+37 }
 0x108   :  { %v122_v37 = vpop.trf.xlu0 }
 0x109   :  { %v139_v40 = vsel %vm138_vm2, %v122_v37, 1.0 }
 0x10a   :  { %v142_v42 = vmul.f32 %v141_v35, %v139_v40  ;;  %v148_v43 = vmul.f32 %v147_v36, %v139_v40  ;;  %v238_v40 = vstv %s624_s29 }
 0x10c   :  { %v145_v44 = vadd.f32 %v144_v38, %v142_v42  ;;  %v154_v45 = vadd.f32 %v152_v39, %v148_v43 }
 0x10e   :  { %v155_v47 = vmax.f32 %v154_v45, 1e-08  ;;  %v276_v48 = vsel %vm186_vm0, %v145_v44, %v154_v45 }
 0x10f   :  { %v277_v49 = vsel %vm257_vm3, %v276_v48, 0.0 }
 0x110   :  { %450 = vrcp.f32 %v155_v47  ;;  %278 = vxpose.xlu1.b32.start.end [1/1] (short) %v277_v49, 128 }
 0x111   :  { %452 = vrcp.f32 %v216_v46 }
 0x112   :  { %454 = vrcp.f32 %v199_v50 }
 0x116   :  { %v680_v51 = vpop.eup %450 }
 0x117   :  { %v158_v52 = vrot.slane %v680_v51, 1  ;;  %v453_v53 = vpop.eup %452 }
 0x118   :  { %v455_v55 = vpop.eup %454  ;;  %v218_v56 = vmul.f32 %v453_v53, %v216_v46  ;;  %vm223_vm4 = vweird.f32 %v453_v53 }
 0x119   :  { %v160_v54 = vmul.f32 %v158_v52, %v145_v44  ;;  %v201_v59 = vmul.f32 %v455_v55, %v199_v50  ;;  %vm206_vm5 = vweird.f32 %v455_v55  ;;  %vm224_vm7 = vmor %vm222_vm6, %vm223_vm4 }
 0x11a   :  { %v219_v61 = vsub.f32 1.0, %v218_v56  ;;  %vm207_vm9 = vmor %vm205_vm8, %vm206_vm5 }
 0x11b   :  { %v410_v57 = vmul.f32 -1.442695, %v160_v54  ;;  %v183_v58 = vmul.f32 %v160_v54, %v82_v28  ;;  %v202_v62 = vsub.f32 1.0, %v201_v59  ;;  %v235_v28 = vstv %s622_s1 }
 0x11c   :  { %v220_v1 = vmul.f32 %v453_v53, %v219_v61 }
 0x11d   :  { %456 = vpow2.f32 %v410_v57  ;;  %v184_v60 = vsub.f32 %v674_v33, %v183_v58  ;;  %v203_v3 = vmul.f32 %v455_v55, %v202_v62 }
 0x11e   :  { %v221_v4 = vadd.f32 %v453_v53, %v220_v1 }
 0x11f   :  { %v204_v6 = vadd.f32 %v455_v55, %v203_v3 }
 0x120   :  { %v225_v10 = vsel %vm224_vm7, %v453_v53, %v221_v4 }
 0x121   :  { %v208_v13 = vsel %vm207_vm9, %v455_v55, %v204_v6  ;;  %v230_v17 = vsel %vm227_vm10, %v229_v12, %v225_v10  ;;  %v264_v12 = vstv %s618_s27 }
 0x122   :  { %v213_v19 = vsel %vm210_vm11, %v212_v16, %v208_v13  ;;  %v232_v23 = vmul.f32 %v230_v17, %v89_v14 }
 0x123   :  { %v457_v63 = vpop.eup %456  ;;  %v215_v24 = vmul.f32 %v213_v19, %v655_v0 }
 0x124   :  { %v164_v2 = vadd.f32 1.0, %v457_v63 }
 0x125   :  { %v251_v31 = vsub.f32 %v232_v23, %v215_v24 }
 0x126   :  { %458 = vrcp.f32 %v164_v2  ;;  %v176_v20 = vand.u32 2147483648, %v164_v2  ;;  %v174_v22 = vand.u32 2147483647, %v164_v2  ;;  %vm170_vm13 = vweird.f32 %v164_v2 }
 0x128   :  { %v177_v29 = vor.u32 1.1754944e-38, %v176_v20  ;;  %vm175_vm15 = vcmp.eq.f32.partialorder %v174_v22, 8.507059e+37 }
 0x12c   :  { %v459_v11 = vpop.eup %458 }
 0x12d   :  { %v166_v15 = vmul.f32 %v459_v11, %v164_v2  ;;  %vm171_vm12 = vweird.f32 %v459_v11 }
 0x12e   :  { %vm172_vm14 = vmor %vm170_vm13, %vm171_vm12 }
 0x12f   :  { %v167_v18 = vsub.f32 1.0, %v166_v15 }
 0x131   :  { %v168_v21 = vmul.f32 %v459_v11, %v167_v18 }
 0x133   :  { %v169_v25 = vadd.f32 %v459_v11, %v168_v21 }
 0x135   :  { %v173_v30 = vsel %vm172_vm14, %v459_v11, %v169_v25 }
 0x136   :  { %v178_v32 = vsel %vm175_vm15, %v177_v29, %v173_v30 }
 0x137   :  { %v180_v33 = vsub.f32 1.0, %v178_v32  ;;  %v234_v34 = vsub.f32 %v178_v32, %v233_v27  ;;  %v236_v35 = vsub.f32 %v178_v32, %v235_v28  ;;  %v252_v36 = vmul.f32 %v251_v31, %v178_v32 }
 0x139   :  { %v181_v37 = vmul.f32 %v180_v33, %v178_v32  ;;  %v237_v38 = vmul.f32 2.0, %v234_v34  ;;  %v244_v39 = vmul.f32 2.0, %v236_v35  ;;  %v247_v46 = vmul.f32 %v236_v35, %v236_v35 }
 0x13a   :  { %v241_v47 = vmul.f32 %v234_v34, %v234_v34  ;;  %v254_v55 = vrot.slane %v252_v36, 7 }
 0x13b   :  { %v182_v0 = vmul.f32 %v181_v37, %v158_v52  ;;  %v239_v42 = vsub.f32 %v237_v38, %v238_v40  ;;  %v245_v43 = vadd.f32 %v244_v39, %v238_v40 }
 0x13d   :  { %v185_v41 = vmul.f32 %v184_v60, %v182_v0 }
 0x13f   :  { %v240_v44 = vmul.f32 %v239_v42, %v185_v41  ;;  %v246_v45 = vmul.f32 %v245_v43, %v185_v41 }
 0x141   :  { %v248_v48 = vadd.f32 %v247_v46, %v246_v45  ;;  %v242_v49 = vadd.f32 %v241_v47, %v240_v44 }
 0x143   :  { %v249_v50 = vmul.f32 %v248_v48, %v232_v23  ;;  %v243_v53 = vmul.f32 %v242_v49, %v215_v24 }
 0x145   :  { %v250_v54 = vadd.f32 %v249_v50, %v243_v53 }
 0x147   :  { %v256_v56 = vsel %vm186_vm0, %v250_v54, %v254_v55  ;;  %vm269_vm0 = vcmp.eq.s32.totalorder %v659_v26, 1 }
 0x148   :  { %v258_v57 = vsel %vm257_vm3, %v256_v56, 0.0 }
 0x1b4   :  { %v294_v58 = vpop.trf.xlu1 }
 0x1b5   :  { %310 = vst [vmem:[#allocation2] sm:$0xff] %v294_v58 }
 0x1bc   :  { %v295_v51 = vpop.trf.xlu1 }
 0x1bd   :  { %311 = vst [vmem:[#allocation2 + $0x8] sm:$0xff] %v295_v51 }
 0x1c4   :  { %v296_v52 = vpop.trf.xlu1 }
 0x1c5   :  { %312 = vst [vmem:[#allocation2 + $0x10] sm:$0xff] %v296_v52 }
 0x1cc   :  { %v297_v59 = vpop.trf.xlu1 }
 0x1cd   :  { %313 = vst [vmem:[#allocation2 + $0x18] sm:$0xff] %v297_v59 }
 0x1d4   :  { %v298_v60 = vpop.trf.xlu1 }
 0x1d5   :  { %314 = vst [vmem:[#allocation2 + $0x20] sm:$0xff] %v298_v60 }
 0x1dc   :  { %v299_v61 = vpop.trf.xlu1 }
 0x1dd   :  { %315 = vst [vmem:[#allocation2 + $0x28] sm:$0xff] %v299_v61 }
 0x1e4   :  { %v300_v62 = vpop.trf.xlu1 }
 0x1e5   :  { %316 = vst [vmem:[#allocation2 + $0x30] sm:$0xff] %v300_v62 }
 0x1e8   :  { %259 = vadd.xlane.f32.xlu1 %v258_v57 }
 0x1ec   :  { %v301_v63 = vpop.trf.xlu1 }
 0x1ed   :  { %317 = vst [vmem:[#allocation2 + $0x38] sm:$0xff] %v301_v63 }
 0x1f4   :  { %v302_v1 = vpop.trf.xlu1 }
 0x1f5   :  { %318 = vst [vmem:[#allocation2 + $0x40] sm:$0xff] %v302_v1 }
 0x1fc   :  { %v303_v2 = vpop.trf.xlu1 }
 0x1fd   :  { %319 = vst [vmem:[#allocation2 + $0x48] sm:$0xff] %v303_v2 }
 0x204   :  { %v304_v3 = vpop.trf.xlu1 }
 0x205   :  { %320 = vst [vmem:[#allocation2 + $0x50] sm:$0xff] %v304_v3 }
 0x20c   :  { %v305_v4 = vpop.trf.xlu1 }
 0x20d   :  { %321 = vst [vmem:[#allocation2 + $0x58] sm:$0xff] %v305_v4 }
 0x214   :  { %v306_v5 = vpop.trf.xlu1 }
 0x215   :  { %322 = vst [vmem:[#allocation2 + $0x60] sm:$0xff] %v306_v5 }
 0x21c   :  { %v307_v6 = vpop.trf.xlu1 }
 0x21d   :  { %323 = vst [vmem:[#allocation2 + $0x68] sm:$0xff] %v307_v6 }
 0x224   :  { %v308_v7 = vpop.trf.xlu1 }
 0x225   :  { %324 = vst [vmem:[#allocation2 + $0x70] sm:$0xff] %v308_v7 }
 0x22c   :  { %v309_v8 = vpop.trf.xlu1 }
 0x22d   :  { %325 = vst [vmem:[#allocation2 + $0x78] sm:$0xff] %v309_v8 }
 0x25b   :  { %v260_v10 = vpop.xlane.xlu1 %259 }
 0x25c   :  { %v262_v11 = vadd.f32 %v261_v9, %v260_v10 }
 0x25e   :  { %v263_v13 = vsub.f32 %v262_v11, %v238_v40 }
 0x260   :  { %v265_v14 = vmul.f32 %v264_v12, %v263_v13 }
 0x262   :  { %v266_v15 = vadd.f32 %v265_v14, %v238_v40 }
 0x264   :  { %v267_v16 = vmax.f32 %v266_v15, 0.0 }
 0x266   :  { %v270_v17 = vsel %vm269_vm0, %v267_v16, 0.0 }
 0x267   :  { %v272_v18 = vrot.slane %v270_v17, 1 }
 0x269   :  { %v274_v19 = vsel %vm268_vm1, %v260_v10, %v272_v18 }
 0x26a   :  { %275 = vst [vmem:[%s729_s5] sm:$0x1] %v274_v19 }
 0x26b LB: > { %s332_s0 = sld [smem:[#allocation4 + %s566_s26]]  ;;  %s333_s27 = scalar_lea.vmem [#allocation2], %s566_s26  ;;  %s566_s26 = sphi %s703_s26, %s331_s26  }
 0x26c   : > { %s343_s28 = sshll.u32 %s333_s27, 4  ;;  %s344_s28 = int_to_ptr.vmem [resolvable:$true] %s343_s28 }
 0x26d   : > { %s508_s5 = sshra.s32 %s344_s28, 4  ;;  %s509_s5 = int_to_ptr.vmem [resolvable:$true] %s508_s5 }
 0x26e   : > { %s510_s18 = scalar_lea.vmem %s509_s5, 1  ;;  %p513_p13 = scmp.lt.s32.totalorder %s509_s5, [#allocation2] }
 0x26f   : > { %p511_p12 = scmp.ne.s32.totalorder %s509_s5, %s510_s18  ;;  %p514_p0 = scmp.lt.s32.totalorder %s646_s3, %s510_s18 }
 0x271   : > { %s334_s15 = scalar_lea.hbm %s728_s4, %s332_s0  ;;  %p515_p1 = por %p514_p0, %p513_p13 }
 0x272   : > { %s345_s16 = sshll.u32 %s334_s15, 4  ;;  %s346_s16 = int_to_ptr.hbm [resolvable:$true] %s345_s16 }
 0x273   : > { %p516_p2 = pnand %p515_p1, %p511_p12 }
 0x275   : > { %519 = shalt.err (!%p516_p2)  }
 0x276   : > { %s520_s19 = sshra.s32 %s346_s16, 4  ;;  %s521_s19 = int_to_ptr.hbm [resolvable:$true] %s520_s19 }
 0x277   : > { %s522_s20 = scalar_lea.hbm %s521_s19, 1  ;;  %p525_p4 = scmp.lt.s32.totalorder %s521_s19, %s728_s4 }
 0x278   : > { %p523_p3 = scmp.ne.s32.totalorder %s521_s19, %s522_s20  ;;  %p526_p5 = scmp.lt.s32.totalorder %s488_s17, %s522_s20 }
 0x27a   : > { %p527_p6 = por %p526_p5, %p525_p4 }
 0x27c   : > { %p528_p7 = pnand %p527_p6, %p523_p3 }
 0x27e   : > { %531 = shalt.err (!%p528_p7)  }
 0x27f   : > { %348 = dma.vmem_to_hbm [thread:$0]  %s344_s28, 16, %s346_s16, [#allocation3 + $0x1] }
 0x280   : > { %s331_s26 = sadd.s32 1, %s566_s26  }
 0x281   : > { %p328_p8 = scmp.ge.s32.totalorder %s331_s26, 8  }
 0x282   :  { %s568_s6 = smov (%p328_p8), 0  }
 0x283   :  { %330 = sbr.rel (!%p328_p8) target bundleno = 619 (0x26b), region = 105 }
 0x288 LB: > { %554 = dma.done.wait [#allocation3 + $0x1], 16  ;;  %s570_s6 = sphi %s568_s6, %s354_s6  }
 0x289   : > { %555 = vsyncadd [#allocation3 + $0x1], 4294967280  ;;  %s354_s6 = sadd.s32 1, %s570_s6  }
 0x28a   : > { %p351_p9 = scmp.ge.s32.totalorder %s354_s6, 8  }
 0x28c   :  { %353 = sbr.rel (!%p351_p9) target bundleno = 648 (0x288), region = 116 }
 0x291   :  { %364 = vsyncpa [#allocation5], 1 }
 0x292   :  { %365 = vsyncpa [#allocation7], 1 }
 0x293   :  { %366 = vsyncmov [#allocation3] }
 0x296   :  { %s367_s7 = vpop.sfrf %366 }
 0x297   :  { %p411_p10 = scmp.ne.s32.totalorder %s367_s7, 0 }
 0x299   :  { %371 = shalt.err (%p411_p10)  }
 0x29a   :  { %373 = vsyncmov [#allocation3 + $0x1] }
 0x29d   :  { %s374_s9 = vpop.sfrf %373 }
 0x29e   :  { %p412_p11 = scmp.ne.s32.totalorder %s374_s9, 0 }
 0x2a0   :  { %378 = shalt.err (%p412_p11)  }

</bundles_post_ra>
